<compile_context>
chip_gen: v5e
topology: v5e:2x2
jax: 0.10.0
libtpu: 0.0.40
codegen_flags: <defaults>
</compile_context>

<pallas_src>
import jax
import jax.numpy as jnp
from jax.experimental import pallas as pl
from jax.experimental.pallas import tpu as pltpu

EPS = 1e-5


def _vmem_limit_bytes():
    """Scoped-VMEM budget: ~3/4 of physical VMEM, capped at 100 MiB."""
    try:
        cap = int(pltpu.get_tpu_info().vmem_capacity_bytes)
    except Exception:
        return 64 * 1024 * 1024
    return max(32 * 1024 * 1024, min((cap * 3) // 4, 100 * 1024 * 1024))


# ---------------------------------------------------------------------------
# Kernels
# ---------------------------------------------------------------------------
def _pw_bias_relu_kernel(x_ref, w_ref, b_ref, o_ref):
    # 1x1x1 conv (BN scale pre-folded into w) + bias + ReLU on one bf16 row tile.
    y = jnp.dot(x_ref[...], w_ref[...], preferred_element_type=jnp.float32)
    o_ref[...] = jnp.maximum(y + b_ref[...], 0.0).astype(o_ref.dtype)


def _make_fused_conv2_conv3_kernel(h, w, dilation):
    """Fused: dilated 3x3x3 conv + bn2 + relu + 1x1x1 conv + bn3 + residual + relu.

    One grid step == one (n, d) output plane of h*w rows.  For each depth tap kd
    the nine in-plane (kh, kw) shifts of the halo-padded plane are packed into an
    (hw, 9*cp) im2col scratch (static VMEM slices) and contracted with the
    folded weight slab w2[kd] of shape (9*cp, cmid) in a single big-K MXU pass;
    the three per-kd dots accumulate in f32.
    """
    hw = h * w

    def kernel(t0_ref, t1_ref, t2_ref, w2_ref, b2_ref, w3_ref, b3_ref,
               r_ref, o_ref, col_ref):
        taps = (t0_ref, t1_ref, t2_ref)
        cp = t0_ref.shape[-1]
        cmid = w2_ref.shape[-1]

        acc = jnp.zeros((hw, cmid), jnp.float32)
        for kd in range(3):
            # Assemble the im2col slab for this depth tap in VMEM scratch.
            for kh in range(3):
                hs = kh * dilation
                for kw in range(3):
                    ws = kw * dilation
                    t = kh * 3 + kw
                    piece = taps[kd][pl.ds(hs, h), pl.ds(ws, w), :]
                    col_ref[:, t * cp:(t + 1) * cp] = piece.reshape(hw, cp)
            # One big-K (K = 9*cp) matmul per depth tap, f32 accumulation.
            acc = acc + jnp.dot(col_ref[...], w2_ref[kd],
                                preferred_element_type=jnp.float32)

        # bn2 (folded) + relu, then conv3 + bn3 (folded) + residual + relu.
        h2 = jnp.maximum(acc + b2_ref[...], 0.0).astype(w3_ref.dtype)
        y = jnp.dot(h2, w3_ref[...], preferred_element_type=jnp.float32)
        y = y + b3_ref[...] + r_ref[...].astype(jnp.float32)
        o_ref[...] = jnp.maximum(y, 0.0).astype(o_ref.dtype)

    return kernel


# ---------------------------------------------------------------------------
# pallas_call wrappers
# ---------------------------------------------------------------------------
def _pick_row_tile(m, max_tile=1024):
    # Largest divisor of m that is <= max_tile (always valid, never one huge block).
    t = min(m, max_tile)
    while m % t:
        t -= 1
    return t


def pw_bias_relu(x2d, w, b, out_dtype=jnp.bfloat16):
    m, cin = x2d.shape
    cout = w.shape[1]
    tm = _pick_row_tile(m)
    return pl.pallas_call(
        _pw_bias_relu_kernel,
        out_shape=jax.ShapeDtypeStruct((m, cout), out_dtype),
        grid=(m // tm,),
        in_specs=[
            pl.BlockSpec((tm, cin), lambda i: (i, 0)),
            pl.BlockSpec(w.shape, lambda i: (0, 0)),
            pl.BlockSpec(b.shape, lambda i: (0, 0)),
        ],
        out_specs=pl.BlockSpec((tm, cout), lambda i: (i, 0)),
        compiler_params=pltpu.CompilerParams(
            dimension_semantics=("parallel",),
            vmem_limit_bytes=_vmem_limit_bytes()),
    )(x2d, w, b)


def fused_conv2_conv3(h1_pad, res2d, w2, b2, w3, b3, dims, dilation):
    n, d, h, w = dims
    hp, wp = h + 2 * dilation, w + 2 * dilation
    cp = h1_pad.shape[-1]
    cin = res2d.shape[1]
    cout = w3.shape[1]
    m = res2d.shape[0]
    hw = h * w

    kernel = _make_fused_conv2_conv3_kernel(h, w, dilation)

    # One depth-tap plane per spec; index_map picks padded-D plane di + kd*dilation.
    tap_specs = [
        pl.BlockSpec((None, None, hp, wp, cp),
                     lambda ni, di, kd=kd: (ni, di + kd * dilation, 0, 0, 0))
        for kd in range(3)
    ]
    row_map = lambda ni, di: (ni * d + di, 0)

    return pl.pallas_call(
        kernel,
        out_shape=jax.ShapeDtypeStruct((m, cout), jnp.bfloat16),
        grid=(n, d),
        in_specs=tap_specs + [
            pl.BlockSpec(w2.shape, lambda ni, di: (0, 0, 0)),
            pl.BlockSpec(b2.shape, lambda ni, di: (0, 0)),
            pl.BlockSpec(w3.shape, lambda ni, di: (0, 0)),
            pl.BlockSpec(b3.shape, lambda ni, di: (0, 0)),
            pl.BlockSpec((hw, cin), row_map),          # residual rows (bf16)
        ],
        out_specs=pl.BlockSpec((hw, cout), row_map),
        scratch_shapes=[pltpu.VMEM((hw, 9 * cp), jnp.bfloat16)],   # per-kd im2col
        compiler_params=pltpu.CompilerParams(
            dimension_semantics=("parallel", "parallel"),
            vmem_limit_bytes=_vmem_limit_bytes()),
    )(h1_pad, h1_pad, h1_pad, w2, b2, w3, b3, res2d)


# ---------------------------------------------------------------------------
# Bottleneck forward (glue: transposes, single bf16 cast, halo pad)
# ---------------------------------------------------------------------------
def bottleneck_forward(x_ncdhw, params, stride=1, dilation=1):
    assert stride == 1, "downsample=None configuration requires stride=1"
    n, cin, d, h, w = x_ncdhw.shape
    cout = params["w3"].shape[1]
    assert cin == cout, "downsample=None requires inplanes == planes * expansion"

    x_cl = jnp.transpose(x_ncdhw, (0, 2, 3, 4, 1))            # NDHWC
    m = n * d * h * w
    # Single bf16 cast: this array feeds conv1 AND is the residual stream.
    x2d = x_cl.reshape(m, cin).astype(jnp.bfloat16)

    # conv1 (1x1x1) + bn1 + relu  (row-tiled, pipelined)
    h1 = pw_bias_relu(x2d, params["w1"], params["b1"])        # (m, planes) bf16
    planes = h1.shape[1]

    # Single halo pad for conv2 (bf16, half the bytes of the previous f32 pad).
    # TODO(synk): remove this HBM round trip (padded conv1 writeback / in-kernel masks).
    p = dilation
    h1_pad = jnp.pad(h1.reshape(n, d, h, w, planes),
                     ((0, 0), (p, p), (p, p), (p, p), (0, 0)))

    # fused conv2 (dilated 3x3x3) + bn2 + relu + conv3 + bn3 + residual + relu
    out2d = fused_conv2_conv3(h1_pad, x2d, params["w2"], params["b2"],
                              params["w3"], params["b3"], (n, d, h, w), dilation)

    # Output kept in bf16; transpose back to NCDHW to match the PyTorch module.
    return out2d.reshape(n, d, h, w, cout).transpose(0, 4, 1, 2, 3)


# ---------------------------------------------------------------------------
# Parameter prep: PyTorch weight layouts -> channels-last, BN folded into weights
# ---------------------------------------------------------------------------
def make_params(W1, W2, W3, bn1, bn2, bn3, dtype=jnp.bfloat16):
    def fold(p):
        g, b, mu, v = p
        s = g / jnp.sqrt(v + EPS)
        return s, b - mu * s

    s1, c1 = fold(bn1)
    s2, c2 = fold(bn2)
    s3, c3 = fold(bn3)

    w1 = (W1[:, :, 0, 0, 0].T * s1[None, :]).astype(dtype)            # (Cin, P)

    # w2 laid out for the per-kd big-K dot: (3, 9*P, P); rows of slab kd are
    # ordered (kh, kw, cp) matching the in-kernel im2col column order.
    w2_kd = []
    for kd in range(3):
        mats = [W2[:, :, kd, kh, kw].T for kh in range(3) for kw in range(3)]
        w2_kd.append(jnp.concatenate(mats, axis=0))                   # (9*P, P)
    w2 = (jnp.stack(w2_kd, 0) * s2[None, None, :]).astype(dtype)      # (3, 9*P, P)

    w3 = (W3[:, :, 0, 0, 0].T * s3[None, :]).astype(dtype)            # (P, 4P)

    return {
        "w1": w1, "b1": c1.reshape(1, -1).astype(jnp.float32),
        "w2": w2, "b2": c2.reshape(1, -1).astype(jnp.float32),
        "w3": w3, "b3": c3.reshape(1, -1).astype(jnp.float32),
    }


# ---------------------------------------------------------------------------
# Pure-JAX reference (lax conv, NCDHW, f32) for verification
# ---------------------------------------------------------------------------
def reference_forward(x, w1, w2, w3, bn1, bn2, bn3, dilation=1):
    def conv3d(inp, w, dil, pad):
        return jax.lax.conv_general_dilated(
            inp, w, window_strides=(1, 1, 1), padding=[(pad, pad)] * 3,
            rhs_dilation=(dil, dil, dil),
            dimension_numbers=("NCDHW", "OIDHW", "NCDHW"))

    def bn(inp, p):
        g, b, mu, v = (t.reshape(1, -1, 1, 1, 1) for t in p)
        return (inp - mu) / jnp.sqrt(v + EPS) * g + b

    out = jax.nn.relu(bn(conv3d(x, w1, 1, 0), bn1))
    out = jax.nn.relu(bn(conv3d(out, w2, dilation, dilation), bn2))
    out = bn(conv3d(out, w3, 1, 0), bn3)
    return jax.nn.relu(out + x)


# ---------------------------------------------------------------------------
if __name__ == "__main__":
    inplanes, planes = 16, 4          # expansion = 4 -> inplanes == planes*4 (no downsample)
    N, D, H, W = 2, 4, 8, 8

    key = jax.random.PRNGKey(0)
    ks = jax.random.split(key, 8)
    x = jax.random.normal(ks[0], (N, inplanes, D, H, W), jnp.float32)

    # Deterministic synthetic parameters (PyTorch weight layouts).
    W1 = 0.1 * jax.random.normal(ks[1], (planes, inplanes, 1, 1, 1), jnp.float32)
    W2 = 0.1 * jax.random.normal(ks[2], (planes, planes, 3, 3, 3), jnp.float32)
    W3 = 0.1 * jax.random.normal(ks[3], (planes * 4, planes, 1, 1, 1), jnp.float32)

    def bn_params(k, c):
        k1, k2, k3, k4 = jax.random.split(k, 4)
        gamma = 1.0 + 0.1 * jax.random.normal(k1, (c,), jnp.float32)
        beta = 0.1 * jax.random.normal(k2, (c,), jnp.float32)
        mean = 0.1 * jax.random.normal(k3, (c,), jnp.float32)
        var = 0.5 + jax.random.uniform(k4, (c,), jnp.float32)
        return gamma, beta, mean, var

    bn1 = bn_params(ks[4], planes)
    bn2 = bn_params(ks[5], planes)
    bn3 = bn_params(ks[6], planes * 4)

    params = make_params(W1, W2, W3, bn1, bn2, bn3)

    for dilation in (1, 2):   # dilation=2 exercises the DeepLab dilated branch
        out = bottleneck_forward(x, params, stride=1, dilation=dilation)
        out = jax.block_until_ready(out)

        ref = reference_forward(x, W1, W2, W3, bn1, bn2, bn3, dilation)
        assert out.shape == (N, planes * 4, D, H, W), out.shape
        out_f32 = out.astype(jnp.float32)
        max_err = float(jnp.abs(out_f32 - ref).max())
        # bf16 activations / matmuls / output (f32 accumulation) -> relaxed tolerance
        assert jnp.allclose(out_f32, ref, atol=5e-2, rtol=5e-2), max_err

    print("KERNEL_OK")
</pallas_src>

<mosaic_0001>
module attributes {stable_mosaic.version = 11 : i64} {
  func.func @_pw_bias_relu_kernel(%arg0: i32, %arg1: memref<512x16xbf16, #tpu.memory_space<vmem>>, %arg2: memref<16x4xbf16, #tpu.memory_space<vmem>>, %arg3: memref<1x4xf32, #tpu.memory_space<vmem>>, %arg4: memref<512x4xbf16, #tpu.memory_space<vmem>>) attributes {dimension_semantics = [#tpu.dimension_semantics<parallel>], iteration_bounds = array<i64: 1>, scalar_prefetch = 0 : i64, scratch_operands = 0 : i64, tpu.core_type = #tpu.core_type<tc>, window_params = [{transform_indices = @transform_0, window_bounds = array<i64: 512, 16>}, {pipeline_mode = #tpu.pipeline_mode<synchronous>, transform_indices = @transform_1, window_bounds = array<i64: 16, 4>}, {pipeline_mode = #tpu.pipeline_mode<synchronous>, transform_indices = @transform_2, window_bounds = array<i64: 1, 4>}, {transform_indices = @transform_3, window_bounds = array<i64: 512, 4>}]} {
    %c0 = arith.constant 0 : index
    %c0_0 = arith.constant 0 : index
    %0 = vector.load %arg1[%c0, %c0_0] : memref<512x16xbf16, #tpu.memory_space<vmem>>, vector<512x16xbf16>
    %c0_1 = arith.constant 0 : index
    %c0_2 = arith.constant 0 : index
    %1 = vector.load %arg2[%c0_1, %c0_2] : memref<16x4xbf16, #tpu.memory_space<vmem>>, vector<16x4xbf16>
    %cst = arith.constant dense<0.000000e+00> : vector<512x4xf32>
    %2 = tpu.matmul %0, %1, %cst {dimension_numbers = #tpu.dot_dimension_numbers<[1], [0], [0], [1], [0, 0, 1, 1], [], []>} : vector<512x16xbf16>, vector<16x4xbf16>, vector<512x4xf32> -> vector<512x4xf32>
    %c0_3 = arith.constant 0 : index
    %c0_4 = arith.constant 0 : index
    %3 = vector.load %arg3[%c0_3, %c0_4] : memref<1x4xf32, #tpu.memory_space<vmem>>, vector<1x4xf32>
    %4 = vector.broadcast %3 : vector<1x4xf32> to vector<512x4xf32>
    %5 = arith.addf %2, %4 : vector<512x4xf32>
    %cst_5 = arith.constant 0.000000e+00 : f32
    %6 = vector.broadcast %cst_5 : f32 to vector<512x4xf32>
    %7 = arith.maximumf %5, %6 : vector<512x4xf32>
    %8 = arith.truncf %7 : vector<512x4xf32> to vector<512x4xbf16>
    %c0_6 = arith.constant 0 : index
    %c0_7 = arith.constant 0 : index
    %9 = vector.load %arg4[%c0_6, %c0_7] : memref<512x4xbf16, #tpu.memory_space<vmem>>, vector<512x4xbf16>
    tpu.vector_store %arg4[%c0_6, %c0_7], %8 {strides = array<i32>} : memref<512x4xbf16, #tpu.memory_space<vmem>>, vector<512x4xbf16>,
    return
  }
  func.func @transform_0(%arg0: i32) -> (i32, i32) {
    %c0_i32 = arith.constant 0 : i32
    %c0_i32_0 = arith.constant 0 : i32
    return %arg0, %c0_i32 : i32, i32
  }
  func.func @transform_1(%arg0: i32) -> (i32, i32) {
    %c0_i32 = arith.constant 0 : i32
    %c0_i32_0 = arith.constant 0 : i32
    %c0_i32_1 = arith.constant 0 : i32
    return %c0_i32, %c0_i32_0 : i32, i32
  }
  func.func @transform_2(%arg0: i32) -> (i32, i32) {
    %c0_i32 = arith.constant 0 : i32
    %c0_i32_0 = arith.constant 0 : i32
    %c0_i32_1 = arith.constant 0 : i32
    return %c0_i32, %c0_i32_0 : i32, i32
  }
  func.func @transform_3(%arg0: i32) -> (i32, i32) {
    %c0_i32 = arith.constant 0 : i32
    %c0_i32_0 = arith.constant 0 : i32
    return %arg0, %c0_i32 : i32, i32
  }
}

</mosaic_0001>

<bundles_post_ra>
// kernel: tpu_custom_call.1
= control target key start
LH: loop header
LB: loop body
LE: loop exit
PB: predicated region body
PF: predicated region fallthrough
CT: control target
= control target key end

     0   :  { %vm251_vm0 = vcmask 130048   ;;  %vm645_vm1 = vcmask 27648   ;;  %s1391_s1 = inlined_call_operand.vmem [shape: bf16[16,4], index: 1, kind: input, shape index: {}]   ;;  %s1392_s0 = inlined_call_operand.vmem [shape: bf16[512,16], index: 0, kind: input, shape index: {}]   ;;  %s1393_s2 = inlined_call_operand.vmem [shape: f32[1,4], index: 2, kind: input, shape index: {}]   ;;  %s1394_s3 = inlined_call_operand.vmem [shape: bf16[512,4], index: 3, kind: output, shape index: {}]  }
   0x1   :  { %v910_v0 = vld [vmem:[%s1391_s1] sm:$0xff]  ;;  %v879_v5 = vld [vmem:[%s1392_s0 + $0x8] sm:$0xff]  ;;  %v880_v9 = vld [vmem:[%s1392_s0 + $0x10] sm:$0xff] }
   0x2   :  { %v878_v1 = vld [vmem:[%s1392_s0] sm:$0xff]  ;;  %355 = vmatpush.bf16.msra.mxu0 %v910_v0  ;;  %911 = vmatpush.bf16.msra.mxu1 %v910_v0  ;;  %v887_v6 = vld [vmem:[%s1392_s0 + $0x48] sm:$0xff]  ;;  %v888_v10 = vld [vmem:[%s1392_s0 + $0x50] sm:$0xff] }
   0x3   :  { %v886_v2 = vld [vmem:[%s1392_s0 + $0x40] sm:$0xff]  ;;  %912 = vmatpush.bf16.msra.mxu2 %v910_v0  ;;  %913 = vmatpush.bf16.msra.mxu3 %v910_v0  ;;  %v895_v7 = vld [vmem:[%s1392_s0 + $0x88] sm:$0xff]  ;;  %v896_v11 = vld [vmem:[%s1392_s0 + $0x90] sm:$0xff] }
   0x4   :  { %v894_v3 = vld [vmem:[%s1392_s0 + $0x80] sm:$0xff]  ;;  %v903_v8 = vld [vmem:[%s1392_s0 + $0xc8] sm:$0xff]  ;;  %v904_v12 = vld [vmem:[%s1392_s0 + $0xd0] sm:$0xff] }
   0x5   :  { %v902_v4 = vld [vmem:[%s1392_s0 + $0xc0] sm:$0xff]  ;;  %846 = vmatmul.msk.bf16.vlgmr.msra.gmra.mxu0 %vm251_vm0, %v878_v1  ;;  %854 = vmatmul.msk.bf16.vlgmr.msra.gmra.mxu1 %vm251_vm0, %v886_v2  ;;  %v881_v13 = vld [vmem:[%s1392_s0 + $0x18] sm:$0xff]  ;;  %v883_v21 = vld [vmem:[%s1392_s0 + $0x28] sm:$0xff] }
   0x6   :  { %862 = vmatmul.msk.bf16.vlgmr.msra.gmra.mxu2 %vm251_vm0, %v894_v3  ;;  %870 = vmatmul.msk.bf16.vlgmr.msra.gmra.mxu3 %vm251_vm0, %v902_v4  ;;  %v889_v14 = vld [vmem:[%s1392_s0 + $0x58] sm:$0xff]  ;;  %v882_v17 = vld [vmem:[%s1392_s0 + $0x20] sm:$0xff]  ;;  %v891_v22 = vld [vmem:[%s1392_s0 + $0x68] sm:$0xff] }
   0x7   :  { %v897_v15 = vld [vmem:[%s1392_s0 + $0x98] sm:$0xff]  ;;  %v890_v18 = vld [vmem:[%s1392_s0 + $0x60] sm:$0xff]  ;;  %v899_v23 = vld [vmem:[%s1392_s0 + $0xa8] sm:$0xff] }
   0x8   :  { %v905_v16 = vld [vmem:[%s1392_s0 + $0xd8] sm:$0xff]  ;;  %v898_v19 = vld [vmem:[%s1392_s0 + $0xa0] sm:$0xff]  ;;  %v907_v24 = vld [vmem:[%s1392_s0 + $0xe8] sm:$0xff] }
   0x9   :  { %v906_v20 = vld [vmem:[%s1392_s0 + $0xe0] sm:$0xff]  ;;  %v884_v25 = vld [vmem:[%s1392_s0 + $0x30] sm:$0xff]  ;;  %v885_v29 = vld [vmem:[%s1392_s0 + $0x38] sm:$0xff] }
   0xa   :  { %v892_v26 = vld [vmem:[%s1392_s0 + $0x70] sm:$0xff]  ;;  %v893_v30 = vld [vmem:[%s1392_s0 + $0x78] sm:$0xff]  ;;  %v1069_v33 = vld [vmem:[%s1393_s2] ss:$0 sm:$0xff] }
   0xb   :  { %v900_v27 = vld [vmem:[%s1392_s0 + $0xb0] sm:$0xff]  ;;  %v901_v31 = vld [vmem:[%s1392_s0 + $0xb8] sm:$0xff] }
   0xc   :  { %v908_v28 = vld [vmem:[%s1392_s0 + $0xf0] sm:$0xff]  ;;  %v909_v32 = vld [vmem:[%s1392_s0 + $0xf8] sm:$0xff] }
  0x15   :  { %847 = vmatmul.msk.bf16.gmra.mxu0 %vm251_vm0, %v879_v5  ;;  %855 = vmatmul.msk.bf16.gmra.mxu1 %vm251_vm0, %v887_v6 }
  0x16   :  { %863 = vmatmul.msk.bf16.gmra.mxu2 %vm251_vm0, %v895_v7  ;;  %871 = vmatmul.msk.bf16.gmra.mxu3 %vm251_vm0, %v903_v8 }
  0x25   :  { %848 = vmatmul.msk.bf16.gmra.mxu0 %vm251_vm0, %v880_v9  ;;  %856 = vmatmul.msk.bf16.gmra.mxu1 %vm251_vm0, %v888_v10 }
  0x26   :  { %864 = vmatmul.msk.bf16.gmra.mxu2 %vm251_vm0, %v896_v11  ;;  %872 = vmatmul.msk.bf16.gmra.mxu3 %vm251_vm0, %v904_v12 }
  0x35   :  { %849 = vmatmul.msk.bf16.gmra.mxu0 %vm251_vm0, %v881_v13  ;;  %857 = vmatmul.msk.bf16.gmra.mxu1 %vm251_vm0, %v889_v14 }
  0x36   :  { %865 = vmatmul.msk.bf16.gmra.mxu2 %vm251_vm0, %v897_v15  ;;  %873 = vmatmul.msk.bf16.gmra.mxu3 %vm251_vm0, %v905_v16 }
  0x45   :  { %850 = vmatmul.msk.bf16.gmra.mxu0 %vm251_vm0, %v882_v17  ;;  %858 = vmatmul.msk.bf16.gmra.mxu1 %vm251_vm0, %v890_v18 }
  0x46   :  { %866 = vmatmul.msk.bf16.gmra.mxu2 %vm251_vm0, %v898_v19  ;;  %874 = vmatmul.msk.bf16.gmra.mxu3 %vm251_vm0, %v906_v20 }
  0x55   :  { %851 = vmatmul.msk.bf16.gmra.mxu0 %vm251_vm0, %v883_v21  ;;  %859 = vmatmul.msk.bf16.gmra.mxu1 %vm251_vm0, %v891_v22 }
  0x56   :  { %867 = vmatmul.msk.bf16.gmra.mxu2 %vm251_vm0, %v899_v23  ;;  %875 = vmatmul.msk.bf16.gmra.mxu3 %vm251_vm0, %v907_v24 }
  0x65   :  { %852 = vmatmul.msk.bf16.gmra.mxu0 %vm251_vm0, %v884_v25  ;;  %860 = vmatmul.msk.bf16.gmra.mxu1 %vm251_vm0, %v892_v26 }
  0x66   :  { %868 = vmatmul.msk.bf16.gmra.mxu2 %vm251_vm0, %v900_v27  ;;  %876 = vmatmul.msk.bf16.gmra.mxu3 %vm251_vm0, %v908_v28 }
  0x75   :  { %853 = vmatmul.msk.bf16.gmra.mxu0 %vm251_vm0, %v885_v29  ;;  %861 = vmatmul.msk.bf16.gmra.mxu1 %vm251_vm0, %v893_v30 }
  0x76   :  { %869 = vmatmul.msk.bf16.gmra.mxu2 %vm251_vm0, %v901_v31  ;;  %877 = vmatmul.msk.bf16.gmra.mxu3 %vm251_vm0, %v909_v32 }
  0x82   :  { %v357_v34 = vpop.f32.mrf.mxu0  ;;  %v397_v35 = vpop.f32.mrf.mxu1 }
  0x83   :  { %v358_v36 = vadd.f32 %v1069_v33, %v357_v34  ;;  %v398_v37 = vadd.f32 %v1069_v33, %v397_v35 }
  0x85   :  { %v517_v38 = vmax.f32 %v358_v36, 0.0  ;;  %v533_v39 = vmax.f32 %v398_v37, 0.0 }
  0x87   :  { %v581_v40 = vpack.c.bf16 %v517_v38, %v517_v38  ;;  %v597_v41 = vpack.c.bf16 %v533_v39, %v533_v39 }
  0x89   :  { %646 = vst.msk [vmem:[%s1394_s3] sm:$0xf] %vm645_vm1, %v581_v40  ;;  %v437_v42 = vpop.f32.mrf.mxu2  ;;  %v477_v43 = vpop.f32.mrf.mxu3 }
  0x8a   :  { %662 = vst.msk [vmem:[%s1394_s3 + $0x40] sm:$0xf] %vm645_vm1, %v597_v41  ;;  %v438_v44 = vadd.f32 %v1069_v33, %v437_v42  ;;  %v478_v45 = vadd.f32 %v1069_v33, %v477_v43  ;;  %v359_v46 = vpop.f32.mrf.mxu0  ;;  %v399_v47 = vpop.f32.mrf.mxu1 }
  0x8b   :  { %v360_v48 = vadd.f32 %v1069_v33, %v359_v46  ;;  %v400_v49 = vadd.f32 %v1069_v33, %v399_v47 }
  0x8c   :  { %v549_v50 = vmax.f32 %v438_v44, 0.0  ;;  %v565_v51 = vmax.f32 %v478_v45, 0.0 }
  0x8d   :  { %v518_v52 = vmax.f32 %v360_v48, 0.0  ;;  %v534_v53 = vmax.f32 %v400_v49, 0.0 }
  0x8e   :  { %v613_v54 = vpack.c.bf16 %v549_v50, %v549_v50  ;;  %v629_v55 = vpack.c.bf16 %v565_v51, %v565_v51 }
  0x8f   :  { %v582_v56 = vpack.c.bf16 %v518_v52, %v518_v52  ;;  %v598_v57 = vpack.c.bf16 %v534_v53, %v534_v53 }
  0x90   :  { %678 = vst.msk [vmem:[%s1394_s3 + $0x80] sm:$0xf] %vm645_vm1, %v613_v54 }
  0x91   :  { %694 = vst.msk [vmem:[%s1394_s3 + $0xc0] sm:$0xf] %vm645_vm1, %v629_v55  ;;  %v439_v58 = vpop.f32.mrf.mxu2  ;;  %v479_v59 = vpop.f32.mrf.mxu3 }
  0x92   :  { %647 = vst.msk [vmem:[%s1394_s3 + $0x4] sm:$0xf] %vm645_vm1, %v582_v56  ;;  %v440_v60 = vadd.f32 %v1069_v33, %v439_v58  ;;  %v480_v61 = vadd.f32 %v1069_v33, %v479_v59  ;;  %v362_v62 = vpop.f32.mrf.mxu0  ;;  %v402_v63 = vpop.f32.mrf.mxu1 }
  0x93   :  { %663 = vst.msk [vmem:[%s1394_s3 + $0x44] sm:$0xf] %vm645_vm1, %v598_v57  ;;  %v363_v0 = vadd.f32 %v1069_v33, %v362_v62  ;;  %v403_v1 = vadd.f32 %v1069_v33, %v402_v63 }
  0x94   :  { %v550_v2 = vmax.f32 %v440_v60, 0.0  ;;  %v566_v3 = vmax.f32 %v480_v61, 0.0 }
  0x95   :  { %v519_v4 = vmax.f32 %v363_v0, 0.0  ;;  %v535_v5 = vmax.f32 %v403_v1, 0.0 }
  0x96   :  { %v614_v6 = vpack.c.bf16 %v550_v2, %v550_v2  ;;  %v630_v7 = vpack.c.bf16 %v566_v3, %v566_v3 }
  0x97   :  { %v583_v8 = vpack.c.bf16 %v519_v4, %v519_v4  ;;  %v599_v9 = vpack.c.bf16 %v535_v5, %v535_v5 }
  0x98   :  { %679 = vst.msk [vmem:[%s1394_s3 + $0x84] sm:$0xf] %vm645_vm1, %v614_v6 }
  0x99   :  { %695 = vst.msk [vmem:[%s1394_s3 + $0xc4] sm:$0xf] %vm645_vm1, %v630_v7  ;;  %v442_v10 = vpop.f32.mrf.mxu2  ;;  %v482_v11 = vpop.f32.mrf.mxu3 }
  0x9a   :  { %648 = vst.msk [vmem:[%s1394_s3 + $0x8] sm:$0xf] %vm645_vm1, %v583_v8  ;;  %v443_v12 = vadd.f32 %v1069_v33, %v442_v10  ;;  %v483_v13 = vadd.f32 %v1069_v33, %v482_v11  ;;  %v364_v14 = vpop.f32.mrf.mxu0  ;;  %v404_v15 = vpop.f32.mrf.mxu1 }
  0x9b   :  { %664 = vst.msk [vmem:[%s1394_s3 + $0x48] sm:$0xf] %vm645_vm1, %v599_v9  ;;  %v365_v16 = vadd.f32 %v1069_v33, %v364_v14  ;;  %v405_v17 = vadd.f32 %v1069_v33, %v404_v15 }
  0x9c   :  { %v551_v18 = vmax.f32 %v443_v12, 0.0  ;;  %v567_v19 = vmax.f32 %v483_v13, 0.0 }
  0x9d   :  { %v520_v20 = vmax.f32 %v365_v16, 0.0  ;;  %v536_v21 = vmax.f32 %v405_v17, 0.0 }
  0x9e   :  { %v615_v22 = vpack.c.bf16 %v551_v18, %v551_v18  ;;  %v631_v23 = vpack.c.bf16 %v567_v19, %v567_v19 }
  0x9f   :  { %v584_v24 = vpack.c.bf16 %v520_v20, %v520_v20  ;;  %v600_v25 = vpack.c.bf16 %v536_v21, %v536_v21 }
  0xa0   :  { %680 = vst.msk [vmem:[%s1394_s3 + $0x88] sm:$0xf] %vm645_vm1, %v615_v22 }
  0xa1   :  { %696 = vst.msk [vmem:[%s1394_s3 + $0xc8] sm:$0xf] %vm645_vm1, %v631_v23  ;;  %v444_v26 = vpop.f32.mrf.mxu2  ;;  %v484_v27 = vpop.f32.mrf.mxu3 }
  0xa2   :  { %649 = vst.msk [vmem:[%s1394_s3 + $0xc] sm:$0xf] %vm645_vm1, %v584_v24  ;;  %v445_v28 = vadd.f32 %v1069_v33, %v444_v26  ;;  %v485_v29 = vadd.f32 %v1069_v33, %v484_v27  ;;  %v367_v30 = vpop.f32.mrf.mxu0  ;;  %v407_v31 = vpop.f32.mrf.mxu1 }
  0xa3   :  { %665 = vst.msk [vmem:[%s1394_s3 + $0x4c] sm:$0xf] %vm645_vm1, %v600_v25  ;;  %v368_v32 = vadd.f32 %v1069_v33, %v367_v30  ;;  %v408_v34 = vadd.f32 %v1069_v33, %v407_v31 }
  0xa4   :  { %v552_v35 = vmax.f32 %v445_v28, 0.0  ;;  %v568_v36 = vmax.f32 %v485_v29, 0.0 }
  0xa5   :  { %v521_v37 = vmax.f32 %v368_v32, 0.0  ;;  %v537_v38 = vmax.f32 %v408_v34, 0.0 }
  0xa6   :  { %v616_v39 = vpack.c.bf16 %v552_v35, %v552_v35  ;;  %v632_v40 = vpack.c.bf16 %v568_v36, %v568_v36 }
  0xa7   :  { %v585_v41 = vpack.c.bf16 %v521_v37, %v521_v37  ;;  %v601_v42 = vpack.c.bf16 %v537_v38, %v537_v38 }
  0xa8   :  { %681 = vst.msk [vmem:[%s1394_s3 + $0x8c] sm:$0xf] %vm645_vm1, %v616_v39 }
  0xa9   :  { %697 = vst.msk [vmem:[%s1394_s3 + $0xcc] sm:$0xf] %vm645_vm1, %v632_v40  ;;  %v447_v43 = vpop.f32.mrf.mxu2  ;;  %v487_v44 = vpop.f32.mrf.mxu3 }
  0xaa   :  { %650 = vst.msk [vmem:[%s1394_s3 + $0x10] sm:$0xf] %vm645_vm1, %v585_v41  ;;  %v448_v45 = vadd.f32 %v1069_v33, %v447_v43  ;;  %v488_v46 = vadd.f32 %v1069_v33, %v487_v44  ;;  %v369_v47 = vpop.f32.mrf.mxu0  ;;  %v409_v48 = vpop.f32.mrf.mxu1 }
  0xab   :  { %666 = vst.msk [vmem:[%s1394_s3 + $0x50] sm:$0xf] %vm645_vm1, %v601_v42  ;;  %v370_v49 = vadd.f32 %v1069_v33, %v369_v47  ;;  %v410_v50 = vadd.f32 %v1069_v33, %v409_v48 }
  0xac   :  { %v553_v51 = vmax.f32 %v448_v45, 0.0  ;;  %v569_v52 = vmax.f32 %v488_v46, 0.0 }
  0xad   :  { %v522_v53 = vmax.f32 %v370_v49, 0.0  ;;  %v538_v54 = vmax.f32 %v410_v50, 0.0 }
  0xae   :  { %v617_v55 = vpack.c.bf16 %v553_v51, %v553_v51  ;;  %v633_v56 = vpack.c.bf16 %v569_v52, %v569_v52 }
  0xaf   :  { %v586_v57 = vpack.c.bf16 %v522_v53, %v522_v53  ;;  %v602_v58 = vpack.c.bf16 %v538_v54, %v538_v54 }
  0xb0   :  { %682 = vst.msk [vmem:[%s1394_s3 + $0x90] sm:$0xf] %vm645_vm1, %v617_v55 }
  0xb1   :  { %698 = vst.msk [vmem:[%s1394_s3 + $0xd0] sm:$0xf] %vm645_vm1, %v633_v56  ;;  %v449_v59 = vpop.f32.mrf.mxu2  ;;  %v489_v60 = vpop.f32.mrf.mxu3 }
  0xb2   :  { %651 = vst.msk [vmem:[%s1394_s3 + $0x14] sm:$0xf] %vm645_vm1, %v586_v57  ;;  %v450_v61 = vadd.f32 %v1069_v33, %v449_v59  ;;  %v490_v62 = vadd.f32 %v1069_v33, %v489_v60  ;;  %v372_v63 = vpop.f32.mrf.mxu0  ;;  %v412_v0 = vpop.f32.mrf.mxu1 }
  0xb3   :  { %667 = vst.msk [vmem:[%s1394_s3 + $0x54] sm:$0xf] %vm645_vm1, %v602_v58  ;;  %v373_v1 = vadd.f32 %v1069_v33, %v372_v63  ;;  %v413_v2 = vadd.f32 %v1069_v33, %v412_v0 }
  0xb4   :  { %v554_v3 = vmax.f32 %v450_v61, 0.0  ;;  %v570_v4 = vmax.f32 %v490_v62, 0.0 }
  0xb5   :  { %v523_v5 = vmax.f32 %v373_v1, 0.0  ;;  %v539_v6 = vmax.f32 %v413_v2, 0.0 }
  0xb6   :  { %v618_v7 = vpack.c.bf16 %v554_v3, %v554_v3  ;;  %v634_v8 = vpack.c.bf16 %v570_v4, %v570_v4 }
  0xb7   :  { %v587_v9 = vpack.c.bf16 %v523_v5, %v523_v5  ;;  %v603_v10 = vpack.c.bf16 %v539_v6, %v539_v6 }
  0xb8   :  { %683 = vst.msk [vmem:[%s1394_s3 + $0x94] sm:$0xf] %vm645_vm1, %v618_v7 }
  0xb9   :  { %699 = vst.msk [vmem:[%s1394_s3 + $0xd4] sm:$0xf] %vm645_vm1, %v634_v8  ;;  %v452_v11 = vpop.f32.mrf.mxu2  ;;  %v492_v12 = vpop.f32.mrf.mxu3 }
  0xba   :  { %652 = vst.msk [vmem:[%s1394_s3 + $0x18] sm:$0xf] %vm645_vm1, %v587_v9  ;;  %v453_v13 = vadd.f32 %v1069_v33, %v452_v11  ;;  %v493_v14 = vadd.f32 %v1069_v33, %v492_v12  ;;  %v374_v15 = vpop.f32.mrf.mxu0  ;;  %v414_v16 = vpop.f32.mrf.mxu1 }
  0xbb   :  { %668 = vst.msk [vmem:[%s1394_s3 + $0x58] sm:$0xf] %vm645_vm1, %v603_v10  ;;  %v375_v17 = vadd.f32 %v1069_v33, %v374_v15  ;;  %v415_v18 = vadd.f32 %v1069_v33, %v414_v16 }
  0xbc   :  { %v555_v19 = vmax.f32 %v453_v13, 0.0  ;;  %v571_v20 = vmax.f32 %v493_v14, 0.0 }
  0xbd   :  { %v524_v21 = vmax.f32 %v375_v17, 0.0  ;;  %v540_v22 = vmax.f32 %v415_v18, 0.0 }
  0xbe   :  { %v619_v23 = vpack.c.bf16 %v555_v19, %v555_v19  ;;  %v635_v24 = vpack.c.bf16 %v571_v20, %v571_v20 }
  0xbf   :  { %v588_v25 = vpack.c.bf16 %v524_v21, %v524_v21  ;;  %v604_v26 = vpack.c.bf16 %v540_v22, %v540_v22 }
  0xc0   :  { %684 = vst.msk [vmem:[%s1394_s3 + $0x98] sm:$0xf] %vm645_vm1, %v619_v23 }
  0xc1   :  { %700 = vst.msk [vmem:[%s1394_s3 + $0xd8] sm:$0xf] %vm645_vm1, %v635_v24  ;;  %v454_v27 = vpop.f32.mrf.mxu2  ;;  %v494_v28 = vpop.f32.mrf.mxu3 }
  0xc2   :  { %653 = vst.msk [vmem:[%s1394_s3 + $0x1c] sm:$0xf] %vm645_vm1, %v588_v25  ;;  %v455_v29 = vadd.f32 %v1069_v33, %v454_v27  ;;  %v495_v30 = vadd.f32 %v1069_v33, %v494_v28  ;;  %v377_v31 = vpop.f32.mrf.mxu0  ;;  %v417_v32 = vpop.f32.mrf.mxu1 }
  0xc3   :  { %669 = vst.msk [vmem:[%s1394_s3 + $0x5c] sm:$0xf] %vm645_vm1, %v604_v26  ;;  %v378_v34 = vadd.f32 %v1069_v33, %v377_v31  ;;  %v418_v35 = vadd.f32 %v1069_v33, %v417_v32 }
  0xc4   :  { %v556_v36 = vmax.f32 %v455_v29, 0.0  ;;  %v572_v37 = vmax.f32 %v495_v30, 0.0 }
  0xc5   :  { %v525_v38 = vmax.f32 %v378_v34, 0.0  ;;  %v541_v39 = vmax.f32 %v418_v35, 0.0 }
  0xc6   :  { %v620_v40 = vpack.c.bf16 %v556_v36, %v556_v36  ;;  %v636_v41 = vpack.c.bf16 %v572_v37, %v572_v37 }
  0xc7   :  { %v589_v42 = vpack.c.bf16 %v525_v38, %v525_v38  ;;  %v605_v43 = vpack.c.bf16 %v541_v39, %v541_v39 }
  0xc8   :  { %685 = vst.msk [vmem:[%s1394_s3 + $0x9c] sm:$0xf] %vm645_vm1, %v620_v40 }
  0xc9   :  { %701 = vst.msk [vmem:[%s1394_s3 + $0xdc] sm:$0xf] %vm645_vm1, %v636_v41  ;;  %v457_v44 = vpop.f32.mrf.mxu2  ;;  %v497_v45 = vpop.f32.mrf.mxu3 }
  0xca   :  { %654 = vst.msk [vmem:[%s1394_s3 + $0x20] sm:$0xf] %vm645_vm1, %v589_v42  ;;  %v458_v46 = vadd.f32 %v1069_v33, %v457_v44  ;;  %v498_v47 = vadd.f32 %v1069_v33, %v497_v45  ;;  %v379_v48 = vpop.f32.mrf.mxu0  ;;  %v419_v49 = vpop.f32.mrf.mxu1 }
  0xcb   :  { %670 = vst.msk [vmem:[%s1394_s3 + $0x60] sm:$0xf] %vm645_vm1, %v605_v43  ;;  %v380_v50 = vadd.f32 %v1069_v33, %v379_v48  ;;  %v420_v51 = vadd.f32 %v1069_v33, %v419_v49 }
  0xcc   :  { %v557_v52 = vmax.f32 %v458_v46, 0.0  ;;  %v573_v53 = vmax.f32 %v498_v47, 0.0 }
  0xcd   :  { %v526_v54 = vmax.f32 %v380_v50, 0.0  ;;  %v542_v55 = vmax.f32 %v420_v51, 0.0 }
  0xce   :  { %v621_v56 = vpack.c.bf16 %v557_v52, %v557_v52  ;;  %v637_v57 = vpack.c.bf16 %v573_v53, %v573_v53 }
  0xcf   :  { %v590_v58 = vpack.c.bf16 %v526_v54, %v526_v54  ;;  %v606_v59 = vpack.c.bf16 %v542_v55, %v542_v55 }
  0xd0   :  { %686 = vst.msk [vmem:[%s1394_s3 + $0xa0] sm:$0xf] %vm645_vm1, %v621_v56 }
  0xd1   :  { %702 = vst.msk [vmem:[%s1394_s3 + $0xe0] sm:$0xf] %vm645_vm1, %v637_v57  ;;  %v459_v60 = vpop.f32.mrf.mxu2  ;;  %v499_v61 = vpop.f32.mrf.mxu3 }
  0xd2   :  { %655 = vst.msk [vmem:[%s1394_s3 + $0x24] sm:$0xf] %vm645_vm1, %v590_v58  ;;  %v460_v62 = vadd.f32 %v1069_v33, %v459_v60  ;;  %v500_v63 = vadd.f32 %v1069_v33, %v499_v61  ;;  %v382_v0 = vpop.f32.mrf.mxu0  ;;  %v422_v1 = vpop.f32.mrf.mxu1 }
  0xd3   :  { %671 = vst.msk [vmem:[%s1394_s3 + $0x64] sm:$0xf] %vm645_vm1, %v606_v59  ;;  %v383_v2 = vadd.f32 %v1069_v33, %v382_v0  ;;  %v423_v3 = vadd.f32 %v1069_v33, %v422_v1 }
  0xd4   :  { %v558_v4 = vmax.f32 %v460_v62, 0.0  ;;  %v574_v5 = vmax.f32 %v500_v63, 0.0 }
  0xd5   :  { %v527_v6 = vmax.f32 %v383_v2, 0.0  ;;  %v543_v7 = vmax.f32 %v423_v3, 0.0 }
  0xd6   :  { %v622_v8 = vpack.c.bf16 %v558_v4, %v558_v4  ;;  %v638_v9 = vpack.c.bf16 %v574_v5, %v574_v5 }
  0xd7   :  { %v591_v10 = vpack.c.bf16 %v527_v6, %v527_v6  ;;  %v607_v11 = vpack.c.bf16 %v543_v7, %v543_v7 }
  0xd8   :  { %687 = vst.msk [vmem:[%s1394_s3 + $0xa4] sm:$0xf] %vm645_vm1, %v622_v8 }
  0xd9   :  { %703 = vst.msk [vmem:[%s1394_s3 + $0xe4] sm:$0xf] %vm645_vm1, %v638_v9  ;;  %v462_v12 = vpop.f32.mrf.mxu2  ;;  %v502_v13 = vpop.f32.mrf.mxu3 }
  0xda   :  { %656 = vst.msk [vmem:[%s1394_s3 + $0x28] sm:$0xf] %vm645_vm1, %v591_v10  ;;  %v463_v14 = vadd.f32 %v1069_v33, %v462_v12  ;;  %v503_v15 = vadd.f32 %v1069_v33, %v502_v13  ;;  %v384_v16 = vpop.f32.mrf.mxu0  ;;  %v424_v17 = vpop.f32.mrf.mxu1 }
  0xdb   :  { %672 = vst.msk [vmem:[%s1394_s3 + $0x68] sm:$0xf] %vm645_vm1, %v607_v11  ;;  %v385_v18 = vadd.f32 %v1069_v33, %v384_v16  ;;  %v425_v19 = vadd.f32 %v1069_v33, %v424_v17 }
  0xdc   :  { %v559_v20 = vmax.f32 %v463_v14, 0.0  ;;  %v575_v21 = vmax.f32 %v503_v15, 0.0 }
  0xdd   :  { %v528_v22 = vmax.f32 %v385_v18, 0.0  ;;  %v544_v23 = vmax.f32 %v425_v19, 0.0 }
  0xde   :  { %v623_v24 = vpack.c.bf16 %v559_v20, %v559_v20  ;;  %v639_v25 = vpack.c.bf16 %v575_v21, %v575_v21 }
  0xdf   :  { %v592_v26 = vpack.c.bf16 %v528_v22, %v528_v22  ;;  %v608_v27 = vpack.c.bf16 %v544_v23, %v544_v23 }
  0xe0   :  { %688 = vst.msk [vmem:[%s1394_s3 + $0xa8] sm:$0xf] %vm645_vm1, %v623_v24 }
  0xe1   :  { %704 = vst.msk [vmem:[%s1394_s3 + $0xe8] sm:$0xf] %vm645_vm1, %v639_v25  ;;  %v464_v28 = vpop.f32.mrf.mxu2  ;;  %v504_v29 = vpop.f32.mrf.mxu3 }
  0xe2   :  { %657 = vst.msk [vmem:[%s1394_s3 + $0x2c] sm:$0xf] %vm645_vm1, %v592_v26  ;;  %v465_v30 = vadd.f32 %v1069_v33, %v464_v28  ;;  %v505_v31 = vadd.f32 %v1069_v33, %v504_v29  ;;  %v387_v32 = vpop.f32.mrf.mxu0  ;;  %v427_v34 = vpop.f32.mrf.mxu1 }
  0xe3   :  { %673 = vst.msk [vmem:[%s1394_s3 + $0x6c] sm:$0xf] %vm645_vm1, %v608_v27  ;;  %v388_v35 = vadd.f32 %v1069_v33, %v387_v32  ;;  %v428_v36 = vadd.f32 %v1069_v33, %v427_v34 }
  0xe4   :  { %v560_v37 = vmax.f32 %v465_v30, 0.0  ;;  %v576_v38 = vmax.f32 %v505_v31, 0.0 }
  0xe5   :  { %v529_v39 = vmax.f32 %v388_v35, 0.0  ;;  %v545_v40 = vmax.f32 %v428_v36, 0.0 }
  0xe6   :  { %v624_v41 = vpack.c.bf16 %v560_v37, %v560_v37  ;;  %v640_v42 = vpack.c.bf16 %v576_v38, %v576_v38 }
  0xe7   :  { %v593_v43 = vpack.c.bf16 %v529_v39, %v529_v39  ;;  %v609_v44 = vpack.c.bf16 %v545_v40, %v545_v40 }
  0xe8   :  { %689 = vst.msk [vmem:[%s1394_s3 + $0xac] sm:$0xf] %vm645_vm1, %v624_v41 }
  0xe9   :  { %705 = vst.msk [vmem:[%s1394_s3 + $0xec] sm:$0xf] %vm645_vm1, %v640_v42  ;;  %v467_v45 = vpop.f32.mrf.mxu2  ;;  %v507_v46 = vpop.f32.mrf.mxu3 }
  0xea   :  { %658 = vst.msk [vmem:[%s1394_s3 + $0x30] sm:$0xf] %vm645_vm1, %v593_v43  ;;  %v468_v47 = vadd.f32 %v1069_v33, %v467_v45  ;;  %v508_v48 = vadd.f32 %v1069_v33, %v507_v46  ;;  %v389_v49 = vpop.f32.mrf.mxu0  ;;  %v429_v50 = vpop.f32.mrf.mxu1 }
  0xeb   :  { %674 = vst.msk [vmem:[%s1394_s3 + $0x70] sm:$0xf] %vm645_vm1, %v609_v44  ;;  %v390_v51 = vadd.f32 %v1069_v33, %v389_v49  ;;  %v430_v52 = vadd.f32 %v1069_v33, %v429_v50 }
  0xec   :  { %v561_v53 = vmax.f32 %v468_v47, 0.0  ;;  %v577_v54 = vmax.f32 %v508_v48, 0.0 }
  0xed   :  { %v530_v55 = vmax.f32 %v390_v51, 0.0  ;;  %v546_v56 = vmax.f32 %v430_v52, 0.0 }
  0xee   :  { %v625_v57 = vpack.c.bf16 %v561_v53, %v561_v53  ;;  %v641_v58 = vpack.c.bf16 %v577_v54, %v577_v54 }
  0xef   :  { %v594_v59 = vpack.c.bf16 %v530_v55, %v530_v55  ;;  %v610_v60 = vpack.c.bf16 %v546_v56, %v546_v56 }
  0xf0   :  { %690 = vst.msk [vmem:[%s1394_s3 + $0xb0] sm:$0xf] %vm645_vm1, %v625_v57 }
  0xf1   :  { %706 = vst.msk [vmem:[%s1394_s3 + $0xf0] sm:$0xf] %vm645_vm1, %v641_v58  ;;  %v469_v61 = vpop.f32.mrf.mxu2  ;;  %v509_v62 = vpop.f32.mrf.mxu3 }
  0xf2   :  { %659 = vst.msk [vmem:[%s1394_s3 + $0x34] sm:$0xf] %vm645_vm1, %v594_v59  ;;  %v470_v63 = vadd.f32 %v1069_v33, %v469_v61  ;;  %v510_v0 = vadd.f32 %v1069_v33, %v509_v62  ;;  %v392_v1 = vpop.f32.mrf.mxu0  ;;  %v432_v2 = vpop.f32.mrf.mxu1 }
  0xf3   :  { %675 = vst.msk [vmem:[%s1394_s3 + $0x74] sm:$0xf] %vm645_vm1, %v610_v60  ;;  %v393_v3 = vadd.f32 %v1069_v33, %v392_v1  ;;  %v433_v4 = vadd.f32 %v1069_v33, %v432_v2 }
  0xf4   :  { %v562_v5 = vmax.f32 %v470_v63, 0.0  ;;  %v578_v6 = vmax.f32 %v510_v0, 0.0 }
  0xf5   :  { %v531_v7 = vmax.f32 %v393_v3, 0.0  ;;  %v547_v8 = vmax.f32 %v433_v4, 0.0 }
  0xf6   :  { %v626_v9 = vpack.c.bf16 %v562_v5, %v562_v5  ;;  %v642_v10 = vpack.c.bf16 %v578_v6, %v578_v6 }
  0xf7   :  { %v595_v11 = vpack.c.bf16 %v531_v7, %v531_v7  ;;  %v611_v12 = vpack.c.bf16 %v547_v8, %v547_v8 }
  0xf8   :  { %691 = vst.msk [vmem:[%s1394_s3 + $0xb4] sm:$0xf] %vm645_vm1, %v626_v9 }
  0xf9   :  { %707 = vst.msk [vmem:[%s1394_s3 + $0xf4] sm:$0xf] %vm645_vm1, %v642_v10  ;;  %v472_v13 = vpop.f32.mrf.mxu2  ;;  %v512_v14 = vpop.f32.mrf.mxu3 }
  0xfa   :  { %660 = vst.msk [vmem:[%s1394_s3 + $0x38] sm:$0xf] %vm645_vm1, %v595_v11  ;;  %v473_v15 = vadd.f32 %v1069_v33, %v472_v13  ;;  %v513_v16 = vadd.f32 %v1069_v33, %v512_v14  ;;  %v394_v17 = vpop.f32.mrf.mxu0  ;;  %v434_v18 = vpop.f32.mrf.mxu1 }
  0xfb   :  { %676 = vst.msk [vmem:[%s1394_s3 + $0x78] sm:$0xf] %vm645_vm1, %v611_v12  ;;  %v395_v19 = vadd.f32 %v1069_v33, %v394_v17  ;;  %v435_v20 = vadd.f32 %v1069_v33, %v434_v18 }
  0xfc   :  { %v563_v21 = vmax.f32 %v473_v15, 0.0  ;;  %v579_v22 = vmax.f32 %v513_v16, 0.0 }
  0xfd   :  { %v532_v23 = vmax.f32 %v395_v19, 0.0  ;;  %v548_v24 = vmax.f32 %v435_v20, 0.0 }
  0xfe   :  { %v627_v25 = vpack.c.bf16 %v563_v21, %v563_v21  ;;  %v643_v26 = vpack.c.bf16 %v579_v22, %v579_v22 }
  0xff   :  { %v596_v27 = vpack.c.bf16 %v532_v23, %v532_v23  ;;  %v612_v28 = vpack.c.bf16 %v548_v24, %v548_v24 }
 0x100   :  { %692 = vst.msk [vmem:[%s1394_s3 + $0xb8] sm:$0xf] %vm645_vm1, %v627_v25 }
 0x101   :  { %708 = vst.msk [vmem:[%s1394_s3 + $0xf8] sm:$0xf] %vm645_vm1, %v643_v26  ;;  %v474_v29 = vpop.f32.mrf.mxu2  ;;  %v514_v30 = vpop.f32.mrf.mxu3 }
 0x102   :  { %661 = vst.msk [vmem:[%s1394_s3 + $0x3c] sm:$0xf] %vm645_vm1, %v596_v27  ;;  %v475_v31 = vadd.f32 %v1069_v33, %v474_v29  ;;  %v515_v32 = vadd.f32 %v1069_v33, %v514_v30 }
 0x103   :  { %677 = vst.msk [vmem:[%s1394_s3 + $0x7c] sm:$0xf] %vm645_vm1, %v612_v28 }
 0x104   :  { %v564_v34 = vmax.f32 %v475_v31, 0.0  ;;  %v580_v35 = vmax.f32 %v515_v32, 0.0 }
 0x106   :  { %v628_v36 = vpack.c.bf16 %v564_v34, %v564_v34  ;;  %v644_v37 = vpack.c.bf16 %v580_v35, %v580_v35 }
 0x108   :  { %693 = vst.msk [vmem:[%s1394_s3 + $0xbc] sm:$0xf] %vm645_vm1, %v628_v36 }
 0x109   :  { %709 = vst.msk [vmem:[%s1394_s3 + $0xfc] sm:$0xf] %vm645_vm1, %v644_v37 }

</bundles_post_ra>
